<compile_context>
chip_gen: v6e
topology: v6e:2x2x1
jax: 0.10.0
libtpu: 0.0.40
codegen_flags: <defaults>
</compile_context>

<pallas_src>
import functools

import jax
import jax.numpy as jnp
from jax.experimental import pallas as pl
from jax.experimental.pallas import tpu as pltpu


_TM_MAX = 512   # M tile for the conv matmuls (v7x-safe, ~85%-of-roofline point)
_TB_MAX = 512   # row tile for the fused tail kernel
_NPAD = 128     # lane-dense width of the fused head output slab


# ----------------------------------------------------------------------------
# Pallas kernel 1: fused  out = relu(x @ w + b)   (used for conv1 and conv2)
# ----------------------------------------------------------------------------
def _matmul_bias_relu_kernel(x_ref, w_ref, b_ref, o_ref):
    acc = jnp.dot(x_ref[...], w_ref[...], preferred_element_type=jnp.float32)
    acc = jnp.maximum(acc + b_ref[...], 0.0)   # b is (1, N), broadcasts over rows
    o_ref[...] = acc.astype(o_ref.dtype)


def matmul_bias_relu(x, w, b, out_dtype=jnp.bfloat16):
    """relu(x @ w + b). x:(M,K) bf16, w:(K,N) bf16, b:(1,N) f32. Tiled over M."""
    M, K = x.shape
    K2, N = w.shape
    assert K == K2, (K, K2)
    tm = M if M <= _TM_MAX else _TM_MAX
    pad = (-M) % tm
    if pad:  # only triggers at large batch; keeps the grid evenly tiled
        x = jnp.pad(x, ((0, pad), (0, 0)))
    Mp = M + pad
    out = pl.pallas_call(
        _matmul_bias_relu_kernel,
        out_shape=jax.ShapeDtypeStruct((Mp, N), out_dtype),
        grid=(Mp // tm,),
        in_specs=[
            pl.BlockSpec((tm, K), lambda i: (i, 0)),
            pl.BlockSpec((K, N), lambda i: (0, 0)),
            pl.BlockSpec((1, N), lambda i: (0, 0)),
        ],
        out_specs=pl.BlockSpec((tm, N), lambda i: (i, 0)),
        compiler_params=pltpu.CompilerParams(dimension_semantics=("parallel",)),
    )(x, w, b)
    return out if pad == 0 else out[:M]


# ----------------------------------------------------------------------------
# Pallas kernel 2: fused tail
#   conv3 (1x1 out) -> merged actor/critic Linear1+ReLU -> merged block-diagonal
#   Linear2 -> masked softmax.  Output: lane-dense (tb, 128) slab.
# ----------------------------------------------------------------------------
def _tail_kernel(x_ref, w3_ref, b3_ref, wh_ref, bh_ref, w2_ref, b2_ref, o_ref,
                 *, action_dim):
    # conv3 (single 1x1 spatial output) == Linear; fused bias + ReLU.
    feats = jnp.dot(x_ref[...], w3_ref[...], preferred_element_type=jnp.float32)
    feats = jnp.maximum(feats + b3_ref[...], 0.0)

    # merged actor/critic Linear-1 + ReLU:  h = [h_actor | h_critic]
    h = jnp.dot(feats.astype(jnp.bfloat16), wh_ref[...],
                preferred_element_type=jnp.float32)
    h = jnp.maximum(h + bh_ref[...], 0.0)

    # merged block-diagonal Linear-2:
    #   cols [0, action_dim) -> actor logits (from h_actor rows)
    #   col  action_dim      -> critic value (from h_critic rows)
    #   cols > action_dim    -> zero padding (lane-dense 128-wide slab)
    z = jnp.dot(h.astype(jnp.bfloat16), w2_ref[...],
                preferred_element_type=jnp.float32) + b2_ref[...]

    col = jax.lax.broadcasted_iota(jnp.int32, z.shape, dimension=1)
    is_logit = col < action_dim
    masked = jnp.where(is_logit, z, -1e30)          # padded lanes: exp() == 0
    m = jnp.max(masked, axis=-1, keepdims=True)
    e = jnp.exp(masked - m)
    probs = e * pl.reciprocal(jnp.sum(e, axis=-1, keepdims=True), approx=True)

    out = jnp.where(is_logit, probs, jnp.where(col == action_dim, z, 0.0))
    o_ref[...] = out.astype(o_ref.dtype)            # one full-width (128-lane) store


def fused_tail(x3, p, *, action_dim):
    B, K3 = x3.shape
    F = p["w3"].shape[1]       # conv3 output channels (= feature size)
    H2 = p["wh1"].shape[1]     # 2 * hidden_dim
    assert p["w2c"].shape == (H2, _NPAD)

    tb = B if B <= _TB_MAX else _TB_MAX
    pad = (-B) % tb
    if pad:  # zero-padded rows are harmless (finite logits, sliced off below)
        x3 = jnp.pad(x3, ((0, pad), (0, 0)))
    Bp = B + pad

    kernel = functools.partial(_tail_kernel, action_dim=action_dim)
    out = pl.pallas_call(
        kernel,
        out_shape=jax.ShapeDtypeStruct((Bp, _NPAD), jnp.float32),
        grid=(Bp // tb,),
        in_specs=[
            pl.BlockSpec((tb, K3), lambda i: (i, 0)),
            pl.BlockSpec((K3, F), lambda i: (0, 0)),
            pl.BlockSpec((1, F), lambda i: (0, 0)),
            pl.BlockSpec((F, H2), lambda i: (0, 0)),
            pl.BlockSpec((1, H2), lambda i: (0, 0)),
            pl.BlockSpec((H2, _NPAD), lambda i: (0, 0)),
            pl.BlockSpec((1, _NPAD), lambda i: (0, 0)),
        ],
        out_specs=pl.BlockSpec((tb, _NPAD), lambda i: (i, 0)),
        compiler_params=pltpu.CompilerParams(dimension_semantics=("parallel",)),
    )(x3, p["w3"], p["b3"], p["wh1"], p["bh1"], p["w2c"], p["b2c"])
    return out if pad == 0 else out[:B]


# ----------------------------------------------------------------------------
# Glue: im2col (pure layout plumbing; the matmul itself is in the Pallas kernel)
# Patch features ordered (kh, kw, cin) to match the pre-transposed weights.
# ----------------------------------------------------------------------------
def _im2col(x_nhwc, kh, kw, stride):
    N, H, W, C = x_nhwc.shape
    oh = (H - kh) // stride + 1
    ow = (W - kw) // stride + 1
    slices = []
    for di in range(kh):
        for dj in range(kw):
            slices.append(jax.lax.slice(
                x_nhwc,
                (0, di, dj, 0),
                (N, di + (oh - 1) * stride + 1, dj + (ow - 1) * stride + 1, C),
                (1, stride, stride, 1)))
    p = jnp.stack(slices, axis=3)                       # (N, oh, ow, kh*kw, C)
    return p.reshape(N * oh * ow, kh * kw * C), oh, ow


# ----------------------------------------------------------------------------
# One-time parameter packing (hoisted out of the hot path)
# ----------------------------------------------------------------------------
def pack_params(params, action_dim, hidden_dim):
    def conv_w(w):  # (Cout, Cin, KH, KW) -> (KH*KW*Cin, Cout), bf16
        cout, cin, kh, kw = w.shape
        return jnp.transpose(w, (2, 3, 1, 0)).reshape(kh * kw * cin, cout).astype(jnp.bfloat16)

    A, H = action_dim, hidden_dim
    assert A + 1 <= _NPAD
    # block-diagonal merged second-layer weight / bias (lane-padded to 128)
    w2c = jnp.zeros((2 * H, _NPAD), jnp.float32)
    w2c = w2c.at[:H, :A].set(params["actor_w2"])
    w2c = w2c.at[H:, A].set(params["critic_w2"][:, 0])
    b2c = jnp.zeros((1, _NPAD), jnp.float32)
    b2c = b2c.at[0, :A].set(params["actor_b2"])
    b2c = b2c.at[0, A].set(params["critic_b2"][0])

    return {
        "w1": conv_w(params["conv1_w"]),
        "b1": params["conv1_b"].reshape(1, -1).astype(jnp.float32),
        "w2": conv_w(params["conv2_w"]),
        "b2": params["conv2_b"].reshape(1, -1).astype(jnp.float32),
        "w3": conv_w(params["conv3_w"]),
        "b3": params["conv3_b"].reshape(1, -1).astype(jnp.float32),
        "wh1": jnp.concatenate([params["actor_w1"], params["critic_w1"]], axis=1).astype(jnp.bfloat16),
        "bh1": jnp.concatenate([params["actor_b1"], params["critic_b1"]]).reshape(1, -1).astype(jnp.float32),
        "w2c": w2c.astype(jnp.bfloat16),
        "b2c": b2c,
    }


# ----------------------------------------------------------------------------
# ActorCritic forward (packed params)
# ----------------------------------------------------------------------------
def actor_critic_forward(state_nchw, p, *, action_dim):
    n = state_nchw.shape[0]
    # NCHW (PyTorch) -> NHWC, bf16 operands for the MXU (f32 accumulation in-kernel)
    x = jnp.transpose(state_nchw, (0, 2, 3, 1)).astype(jnp.bfloat16)

    # conv1 (k8, s4) + ReLU as a tiled matmul over im2col patches
    patches1, oh1, ow1 = _im2col(x, 8, 8, 4)
    y1 = matmul_bias_relu(patches1, p["w1"], p["b1"]).reshape(n, oh1, ow1, 32)

    # conv2 (k4, s2) + ReLU
    patches2, oh2, ow2 = _im2col(y1, 4, 4, 2)
    y2 = matmul_bias_relu(patches2, p["w2"], p["b2"]).reshape(n, oh2, ow2, 64)

    # conv3 (k3, s1) output is 1x1 spatially, so its single im2col patch is just
    # the NHWC flatten of y2 -> the whole tail runs in one fused Pallas kernel.
    # (NHWC vs NCHW flatten order coincide when the spatial output is 1x1.)
    assert (oh2 - 3 + 1, ow2 - 3 + 1) == (1, 1), \
        "fused tail assumes conv3 output is 1x1 (e.g. 36x36 input)"
    x3 = y2.reshape(n, oh2 * ow2 * 64)

    out = fused_tail(x3, p, action_dim=action_dim)    # (B, 128) lane-dense slab
    action_probs = out[:, :action_dim]
    value = out[:, action_dim:action_dim + 1]
    return action_probs, value


# ----------------------------------------------------------------------------
# Pure-JAX reference (same bf16/f32 precision path) for correctness checking
# ----------------------------------------------------------------------------
def reference_forward(state_nchw, params, action_dim):
    x = jnp.transpose(state_nchw, (0, 2, 3, 1)).astype(jnp.bfloat16)

    def conv_relu(x, w, b, stride):
        cout, cin, kh, kw = w.shape
        patches, oh, ow = _im2col(x, kh, kw, stride)
        wm = jnp.transpose(w, (2, 3, 1, 0)).reshape(kh * kw * cin, cout).astype(jnp.bfloat16)
        y = jnp.dot(patches, wm, preferred_element_type=jnp.float32) + b.astype(jnp.float32)
        return jnp.maximum(y, 0.0).astype(jnp.bfloat16).reshape(x.shape[0], oh, ow, cout)

    y = conv_relu(x, params["conv1_w"], params["conv1_b"], 4)
    y = conv_relu(y, params["conv2_w"], params["conv2_b"], 2)
    y = conv_relu(y, params["conv3_w"], params["conv3_b"], 1)
    feats = jnp.transpose(y, (0, 3, 1, 2)).reshape(y.shape[0], -1)  # NCHW flatten

    def lin(x, w, b):
        return jnp.dot(x.astype(jnp.bfloat16), w.astype(jnp.bfloat16),
                       preferred_element_type=jnp.float32) + b.astype(jnp.float32)

    ha = jnp.maximum(lin(feats, params["actor_w1"], params["actor_b1"]), 0.0)
    probs = jax.nn.softmax(lin(ha, params["actor_w2"], params["actor_b2"]), axis=-1)
    hc = jnp.maximum(lin(feats, params["critic_w1"], params["critic_b1"]), 0.0)
    value = lin(hc, params["critic_w2"], params["critic_b2"])
    return probs, value


# ----------------------------------------------------------------------------
# Deterministic parameter init (synthetic; shapes follow the module __init__)
# ----------------------------------------------------------------------------
def init_params(key, state_dim, action_dim, hidden_dim, feature_size):
    c_in = state_dim[0]
    keys = jax.random.split(key, 14)

    def w(k, shape, fan_in):
        return (jax.random.normal(k, shape, jnp.float32) * (1.0 / jnp.sqrt(fan_in))).astype(jnp.float32)

    return {
        "conv1_w": w(keys[0], (32, c_in, 8, 8), c_in * 8 * 8),
        "conv1_b": w(keys[1], (32,), c_in * 8 * 8),
        "conv2_w": w(keys[2], (64, 32, 4, 4), 32 * 4 * 4),
        "conv2_b": w(keys[3], (64,), 32 * 4 * 4),
        "conv3_w": w(keys[4], (64, 64, 3, 3), 64 * 3 * 3),
        "conv3_b": w(keys[5], (64,), 64 * 3 * 3),
        "actor_w1": w(keys[6], (feature_size, hidden_dim), feature_size),
        "actor_b1": w(keys[7], (hidden_dim,), feature_size),
        "actor_w2": w(keys[8], (hidden_dim, action_dim), hidden_dim),
        "actor_b2": w(keys[9], (action_dim,), hidden_dim),
        "critic_w1": w(keys[10], (feature_size, hidden_dim), feature_size),
        "critic_b1": w(keys[11], (hidden_dim,), feature_size),
        "critic_w2": w(keys[12], (hidden_dim, 1), hidden_dim),
        "critic_b2": w(keys[13], (1,), hidden_dim),
    }


if __name__ == "__main__":
    # Small but conv-stack-consistent shapes:
    #   36x36 input -> conv(k8,s4)=8x8 -> conv(k4,s2)=3x3 -> conv(k3,s1)=1x1
    #   feature_size = 64 * 1 * 1 = 64
    batch = 2
    state_dim = (4, 36, 36)
    action_dim = 6
    hidden_dim = 32
    feature_size = 64 * 1 * 1

    key = jax.random.PRNGKey(0)
    k_x, k_p = jax.random.split(key)
    state = jax.random.normal(k_x, (batch,) + state_dim, jnp.float32)  # NCHW
    params = init_params(k_p, state_dim, action_dim, hidden_dim, feature_size)

    # One-time packing (transposes / concats / casts hoisted out of the hot path)
    packed = pack_params(params, action_dim, hidden_dim)

    fwd = jax.jit(functools.partial(actor_critic_forward, action_dim=action_dim))
    action_probs, value = fwd(state, packed)
    jax.block_until_ready((action_probs, value))

    assert action_probs.shape == (batch, action_dim), action_probs.shape
    assert value.shape == (batch, 1), value.shape
    assert bool(jnp.all(jnp.isfinite(action_probs))) and bool(jnp.all(jnp.isfinite(value)))
    # softmax rows must sum to ~1 (approx reciprocal => loose tolerance)
    assert bool(jnp.all(jnp.abs(jnp.sum(action_probs, axis=-1) - 1.0) < 1e-2))

    # compare against a pure-JAX reference using the same bf16/f32 precision path
    ref_probs, ref_value = reference_forward(state, params, action_dim)
    assert bool(jnp.allclose(action_probs, ref_probs, atol=3e-2, rtol=3e-2))
    assert bool(jnp.allclose(value, ref_value, atol=3e-2, rtol=3e-2))

    print("KERNEL_OK")
</pallas_src>

<mosaic_0001>
module attributes {stable_mosaic.version = 11 : i64} {
  func.func @_matmul_bias_relu_kernel(%arg0: i32, %arg1: memref<128x256xbf16, #tpu.memory_space<vmem>>, %arg2: memref<256x32xbf16, #tpu.memory_space<vmem>>, %arg3: memref<1x32xf32, #tpu.memory_space<vmem>>, %arg4: memref<128x32xbf16, #tpu.memory_space<vmem>>) attributes {dimension_semantics = [#tpu.dimension_semantics<parallel>], iteration_bounds = array<i64: 1>, scalar_prefetch = 0 : i64, scratch_operands = 0 : i64, tpu.core_type = #tpu.core_type<tc>, window_params = [{transform_indices = @transform_0, window_bounds = array<i64: 128, 256>}, {pipeline_mode = #tpu.pipeline_mode<synchronous>, transform_indices = @transform_1, window_bounds = array<i64: 256, 32>}, {pipeline_mode = #tpu.pipeline_mode<synchronous>, transform_indices = @transform_2, window_bounds = array<i64: 1, 32>}, {transform_indices = @transform_3, window_bounds = array<i64: 128, 32>}]} {
    %c0 = arith.constant 0 : index
    %c0_0 = arith.constant 0 : index
    %0 = vector.load %arg1[%c0, %c0_0] : memref<128x256xbf16, #tpu.memory_space<vmem>>, vector<128x256xbf16>
    %c0_1 = arith.constant 0 : index
    %c0_2 = arith.constant 0 : index
    %1 = vector.load %arg2[%c0_1, %c0_2] : memref<256x32xbf16, #tpu.memory_space<vmem>>, vector<256x32xbf16>
    %cst = arith.constant dense<0.000000e+00> : vector<128x32xf32>
    %2 = tpu.matmul %0, %1, %cst {dimension_numbers = #tpu.dot_dimension_numbers<[1], [0], [0], [1], [0, 0, 1, 1], [], []>} : vector<128x256xbf16>, vector<256x32xbf16>, vector<128x32xf32> -> vector<128x32xf32>
    %c0_3 = arith.constant 0 : index
    %c0_4 = arith.constant 0 : index
    %3 = vector.load %arg3[%c0_3, %c0_4] : memref<1x32xf32, #tpu.memory_space<vmem>>, vector<1x32xf32>
    %4 = vector.broadcast %3 : vector<1x32xf32> to vector<128x32xf32>
    %5 = arith.addf %2, %4 : vector<128x32xf32>
    %cst_5 = arith.constant 0.000000e+00 : f32
    %6 = vector.broadcast %cst_5 : f32 to vector<128x32xf32>
    %7 = arith.maximumf %5, %6 : vector<128x32xf32>
    %8 = arith.truncf %7 : vector<128x32xf32> to vector<128x32xbf16>
    %c0_6 = arith.constant 0 : index
    %c0_7 = arith.constant 0 : index
    %9 = vector.load %arg4[%c0_6, %c0_7] : memref<128x32xbf16, #tpu.memory_space<vmem>>, vector<128x32xbf16>
    tpu.vector_store %arg4[%c0_6, %c0_7], %8 {strides = array<i32>} : memref<128x32xbf16, #tpu.memory_space<vmem>>, vector<128x32xbf16>,
    return
  }
  func.func @transform_0(%arg0: i32) -> (i32, i32) {
    %c0_i32 = arith.constant 0 : i32
    %c0_i32_0 = arith.constant 0 : i32
    return %arg0, %c0_i32 : i32, i32
  }
  func.func @transform_1(%arg0: i32) -> (i32, i32) {
    %c0_i32 = arith.constant 0 : i32
    %c0_i32_0 = arith.constant 0 : i32
    %c0_i32_1 = arith.constant 0 : i32
    return %c0_i32, %c0_i32_0 : i32, i32
  }
  func.func @transform_2(%arg0: i32) -> (i32, i32) {
    %c0_i32 = arith.constant 0 : i32
    %c0_i32_0 = arith.constant 0 : i32
    %c0_i32_1 = arith.constant 0 : i32
    return %c0_i32, %c0_i32_0 : i32, i32
  }
  func.func @transform_3(%arg0: i32) -> (i32, i32) {
    %c0_i32 = arith.constant 0 : i32
    %c0_i32_0 = arith.constant 0 : i32
    return %arg0, %c0_i32 : i32, i32
  }
}

module attributes {stable_mosaic.version = 11 : i64} {
  func.func @_matmul_bias_relu_kernel(%arg0: i32, %arg1: memref<18x512xbf16, #tpu.memory_space<vmem>>, %arg2: memref<512x64xbf16, #tpu.memory_space<vmem>>, %arg3: memref<1x64xf32, #tpu.memory_space<vmem>>, %arg4: memref<18x64xbf16, #tpu.memory_space<vmem>>) attributes {dimension_semantics = [#tpu.dimension_semantics<parallel>], iteration_bounds = array<i64: 1>, scalar_prefetch = 0 : i64, scratch_operands = 0 : i64, tpu.core_type = #tpu.core_type<tc>, window_params = [{transform_indices = @transform_0, window_bounds = array<i64: 18, 512>}, {pipeline_mode = #tpu.pipeline_mode<synchronous>, transform_indices = @transform_1, window_bounds = array<i64: 512, 64>}, {pipeline_mode = #tpu.pipeline_mode<synchronous>, transform_indices = @transform_2, window_bounds = array<i64: 1, 64>}, {transform_indices = @transform_3, window_bounds = array<i64: 18, 64>}]} {
    %c0 = arith.constant 0 : index
    %c0_0 = arith.constant 0 : index
    %0 = vector.load %arg1[%c0, %c0_0] : memref<18x512xbf16, #tpu.memory_space<vmem>>, vector<18x512xbf16>
    %c0_1 = arith.constant 0 : index
    %c0_2 = arith.constant 0 : index
    %1 = vector.load %arg2[%c0_1, %c0_2] : memref<512x64xbf16, #tpu.memory_space<vmem>>, vector<512x64xbf16>
    %cst = arith.constant dense<0.000000e+00> : vector<18x64xf32>
    %2 = tpu.matmul %0, %1, %cst {dimension_numbers = #tpu.dot_dimension_numbers<[1], [0], [0], [1], [0, 0, 1, 1], [], []>} : vector<18x512xbf16>, vector<512x64xbf16>, vector<18x64xf32> -> vector<18x64xf32>
    %c0_3 = arith.constant 0 : index
    %c0_4 = arith.constant 0 : index
    %3 = vector.load %arg3[%c0_3, %c0_4] : memref<1x64xf32, #tpu.memory_space<vmem>>, vector<1x64xf32>
    %4 = vector.broadcast %3 : vector<1x64xf32> to vector<18x64xf32>
    %5 = arith.addf %2, %4 : vector<18x64xf32>
    %cst_5 = arith.constant 0.000000e+00 : f32
    %6 = vector.broadcast %cst_5 : f32 to vector<18x64xf32>
    %7 = arith.maximumf %5, %6 : vector<18x64xf32>
    %8 = arith.truncf %7 : vector<18x64xf32> to vector<18x64xbf16>
    %c0_6 = arith.constant 0 : index
    %c0_7 = arith.constant 0 : index
    %9 = vector.load %arg4[%c0_6, %c0_7] : memref<18x64xbf16, #tpu.memory_space<vmem>>, vector<18x64xbf16>
    tpu.vector_store %arg4[%c0_6, %c0_7], %8 {strides = array<i32>} : memref<18x64xbf16, #tpu.memory_space<vmem>>, vector<18x64xbf16>,
    return
  }
  func.func @transform_0(%arg0: i32) -> (i32, i32) {
    %c0_i32 = arith.constant 0 : i32
    %c0_i32_0 = arith.constant 0 : i32
    return %arg0, %c0_i32 : i32, i32
  }
  func.func @transform_1(%arg0: i32) -> (i32, i32) {
    %c0_i32 = arith.constant 0 : i32
    %c0_i32_0 = arith.constant 0 : i32
    %c0_i32_1 = arith.constant 0 : i32
    return %c0_i32, %c0_i32_0 : i32, i32
  }
  func.func @transform_2(%arg0: i32) -> (i32, i32) {
    %c0_i32 = arith.constant 0 : i32
    %c0_i32_0 = arith.constant 0 : i32
    %c0_i32_1 = arith.constant 0 : i32
    return %c0_i32, %c0_i32_0 : i32, i32
  }
  func.func @transform_3(%arg0: i32) -> (i32, i32) {
    %c0_i32 = arith.constant 0 : i32
    %c0_i32_0 = arith.constant 0 : i32
    return %arg0, %c0_i32 : i32, i32
  }
}

module attributes {stable_mosaic.version = 11 : i64} {
  func.func @_tail_kernel(%arg0: i32, %arg1: memref<2x576xbf16, #tpu.memory_space<vmem>>, %arg2: memref<576x64xbf16, #tpu.memory_space<vmem>>, %arg3: memref<1x64xf32, #tpu.memory_space<vmem>>, %arg4: memref<64x64xbf16, #tpu.memory_space<vmem>>, %arg5: memref<1x64xf32, #tpu.memory_space<vmem>>, %arg6: memref<64x128xbf16, #tpu.memory_space<vmem>>, %arg7: memref<1x128xf32, #tpu.memory_space<vmem>>, %arg8: memref<2x128xf32, #tpu.memory_space<vmem>>) attributes {dimension_semantics = [#tpu.dimension_semantics<parallel>], iteration_bounds = array<i64: 1>, scalar_prefetch = 0 : i64, scratch_operands = 0 : i64, tpu.core_type = #tpu.core_type<tc>, window_params = [{transform_indices = @transform_0, window_bounds = array<i64: 2, 576>}, {pipeline_mode = #tpu.pipeline_mode<synchronous>, transform_indices = @transform_1, window_bounds = array<i64: 576, 64>}, {pipeline_mode = #tpu.pipeline_mode<synchronous>, transform_indices = @transform_2, window_bounds = array<i64: 1, 64>}, {pipeline_mode = #tpu.pipeline_mode<synchronous>, transform_indices = @transform_3, window_bounds = array<i64: 64, 64>}, {pipeline_mode = #tpu.pipeline_mode<synchronous>, transform_indices = @transform_4, window_bounds = array<i64: 1, 64>}, {pipeline_mode = #tpu.pipeline_mode<synchronous>, transform_indices = @transform_5, window_bounds = array<i64: 64, 128>}, {pipeline_mode = #tpu.pipeline_mode<synchronous>, transform_indices = @transform_6, window_bounds = array<i64: 1, 128>}, {transform_indices = @transform_7, window_bounds = array<i64: 2, 128>}]} {
    %c0 = arith.constant 0 : index
    %c0_0 = arith.constant 0 : index
    %0 = vector.load %arg1[%c0, %c0_0] : memref<2x576xbf16, #tpu.memory_space<vmem>>, vector<2x576xbf16>
    %c0_1 = arith.constant 0 : index
    %c0_2 = arith.constant 0 : index
    %1 = vector.load %arg2[%c0_1, %c0_2] : memref<576x64xbf16, #tpu.memory_space<vmem>>, vector<576x64xbf16>
    %cst = arith.constant dense<0.000000e+00> : vector<2x64xf32>
    %2 = tpu.matmul %0, %1, %cst {dimension_numbers = #tpu.dot_dimension_numbers<[1], [0], [0], [1], [0, 0, 1, 1], [], []>} : vector<2x576xbf16>, vector<576x64xbf16>, vector<2x64xf32> -> vector<2x64xf32>
    %c0_3 = arith.constant 0 : index
    %c0_4 = arith.constant 0 : index
    %3 = vector.load %arg3[%c0_3, %c0_4] : memref<1x64xf32, #tpu.memory_space<vmem>>, vector<1x64xf32>
    %4 = vector.broadcast %3 : vector<1x64xf32> to vector<2x64xf32>
    %5 = arith.addf %2, %4 : vector<2x64xf32>
    %cst_5 = arith.constant 0.000000e+00 : f32
    %6 = vector.broadcast %cst_5 : f32 to vector<2x64xf32>
    %7 = arith.maximumf %5, %6 : vector<2x64xf32>
    %8 = arith.truncf %7 : vector<2x64xf32> to vector<2x64xbf16>
    %c0_6 = arith.constant 0 : index
    %c0_7 = arith.constant 0 : index
    %9 = vector.load %arg4[%c0_6, %c0_7] : memref<64x64xbf16, #tpu.memory_space<vmem>>, vector<64x64xbf16>
    %cst_8 = arith.constant dense<0.000000e+00> : vector<2x64xf32>
    %10 = tpu.matmul %8, %9, %cst_8 {dimension_numbers = #tpu.dot_dimension_numbers<[1], [0], [0], [1], [0, 0, 1, 1], [], []>} : vector<2x64xbf16>, vector<64x64xbf16>, vector<2x64xf32> -> vector<2x64xf32>
    %c0_9 = arith.constant 0 : index
    %c0_10 = arith.constant 0 : index
    %11 = vector.load %arg5[%c0_9, %c0_10] : memref<1x64xf32, #tpu.memory_space<vmem>>, vector<1x64xf32>
    %12 = vector.broadcast %11 : vector<1x64xf32> to vector<2x64xf32>
    %13 = arith.addf %10, %12 : vector<2x64xf32>
    %cst_11 = arith.constant 0.000000e+00 : f32
    %14 = vector.broadcast %cst_11 : f32 to vector<2x64xf32>
    %15 = arith.maximumf %13, %14 : vector<2x64xf32>
    %16 = arith.truncf %15 : vector<2x64xf32> to vector<2x64xbf16>
    %c0_12 = arith.constant 0 : index
    %c0_13 = arith.constant 0 : index
    %17 = vector.load %arg6[%c0_12, %c0_13] : memref<64x128xbf16, #tpu.memory_space<vmem>>, vector<64x128xbf16>
    %cst_14 = arith.constant dense<0.000000e+00> : vector<2x128xf32>
    %18 = tpu.matmul %16, %17, %cst_14 {dimension_numbers = #tpu.dot_dimension_numbers<[1], [0], [0], [1], [0, 0, 1, 1], [], []>} : vector<2x64xbf16>, vector<64x128xbf16>, vector<2x128xf32> -> vector<2x128xf32>
    %c0_15 = arith.constant 0 : index
    %c0_16 = arith.constant 0 : index
    %19 = vector.load %arg7[%c0_15, %c0_16] : memref<1x128xf32, #tpu.memory_space<vmem>>, vector<1x128xf32>
    %20 = vector.broadcast %19 : vector<1x128xf32> to vector<2x128xf32>
    %21 = arith.addf %18, %20 : vector<2x128xf32>
    %22 = tpu.iota {dimensions = array<i32: 1>} : vector<2x128xi32>
    %c6_i32 = arith.constant 6 : i32
    %23 = vector.broadcast %c6_i32 : i32 to vector<2x128xi32>
    %24 = arith.cmpi slt, %22, %23 : vector<2x128xi32>
    %cst_17 = arith.constant -1.000000e+30 : f32
    %25 = vector.broadcast %cst_17 : f32 to vector<2x128xf32>
    %26 = arith.select %24, %21, %25 : vector<2x128xi1>, vector<2x128xf32>
    %cst_18 = arith.constant dense<0xFF800000> : vector<2xf32>
    %27 = vector.multi_reduction <maximumf>, %26, %cst_18 [1] : vector<2x128xf32> to vector<2xf32>
    %28 = vector.shape_cast %27 : vector<2xf32> to vector<2x1xf32>
    %29 = vector.broadcast %28 : vector<2x1xf32> to vector<2x128xf32>
    %30 = arith.subf %26, %29 : vector<2x128xf32>
    %31 = math.exp %30 : vector<2x128xf32>
    %cst_19 = arith.constant dense<0.000000e+00> : vector<2xf32>
    %32 = vector.multi_reduction <add>, %31, %cst_19 [1] : vector<2x128xf32> to vector<2xf32>
    %33 = vector.shape_cast %32 : vector<2xf32> to vector<2x1xf32>
    %34 = tpu.reciprocal %33 {approx = true} : vector<2x1xf32> -> vector<2x1xf32>
    %35 = vector.broadcast %34 : vector<2x1xf32> to vector<2x128xf32>
    %36 = arith.mulf %31, %35 : vector<2x128xf32>
    %c6_i32_20 = arith.constant 6 : i32
    %37 = vector.broadcast %c6_i32_20 : i32 to vector<2x128xi32>
    %38 = arith.cmpi eq, %22, %37 : vector<2x128xi32>
    %cst_21 = arith.constant 0.000000e+00 : f32
    %39 = vector.broadcast %cst_21 : f32 to vector<2x128xf32>
    %40 = arith.select %38, %21, %39 : vector<2x128xi1>, vector<2x128xf32>
    %41 = arith.select %24, %36, %40 : vector<2x128xi1>, vector<2x128xf32>
    %c0_22 = arith.constant 0 : index
    %c0_23 = arith.constant 0 : index
    %42 = vector.load %arg8[%c0_22, %c0_23] : memref<2x128xf32, #tpu.memory_space<vmem>>, vector<2x128xf32>
    tpu.vector_store %arg8[%c0_22, %c0_23], %41 {strides = array<i32>} : memref<2x128xf32, #tpu.memory_space<vmem>>, vector<2x128xf32>,
    return
  }
  func.func @transform_0(%arg0: i32) -> (i32, i32) {
    %c0_i32 = arith.constant 0 : i32
    %c0_i32_0 = arith.constant 0 : i32
    return %arg0, %c0_i32 : i32, i32
  }
  func.func @transform_1(%arg0: i32) -> (i32, i32) {
    %c0_i32 = arith.constant 0 : i32
    %c0_i32_0 = arith.constant 0 : i32
    %c0_i32_1 = arith.constant 0 : i32
    return %c0_i32, %c0_i32_0 : i32, i32
  }
  func.func @transform_2(%arg0: i32) -> (i32, i32) {
    %c0_i32 = arith.constant 0 : i32
    %c0_i32_0 = arith.constant 0 : i32
    %c0_i32_1 = arith.constant 0 : i32
    return %c0_i32, %c0_i32_0 : i32, i32
  }
  func.func @transform_3(%arg0: i32) -> (i32, i32) {
    %c0_i32 = arith.constant 0 : i32
    %c0_i32_0 = arith.constant 0 : i32
    %c0_i32_1 = arith.constant 0 : i32
    return %c0_i32, %c0_i32_0 : i32, i32
  }
  func.func @transform_4(%arg0: i32) -> (i32, i32) {
    %c0_i32 = arith.constant 0 : i32
    %c0_i32_0 = arith.constant 0 : i32
    %c0_i32_1 = arith.constant 0 : i32
    return %c0_i32, %c0_i32_0 : i32, i32
  }
  func.func @transform_5(%arg0: i32) -> (i32, i32) {
    %c0_i32 = arith.constant 0 : i32
    %c0_i32_0 = arith.constant 0 : i32
    %c0_i32_1 = arith.constant 0 : i32
    return %c0_i32, %c0_i32_0 : i32, i32
  }
  func.func @transform_6(%arg0: i32) -> (i32, i32) {
    %c0_i32 = arith.constant 0 : i32
    %c0_i32_0 = arith.constant 0 : i32
    %c0_i32_1 = arith.constant 0 : i32
    return %c0_i32, %c0_i32_0 : i32, i32
  }
  func.func @transform_7(%arg0: i32) -> (i32, i32) {
    %c0_i32 = arith.constant 0 : i32
    %c0_i32_0 = arith.constant 0 : i32
    return %arg0, %c0_i32 : i32, i32
  }
}

</mosaic_0001>

<bundles_post_ra>
// kernel: actor_critic_forward.3
= control target key start
LH: loop header
LB: loop body
LE: loop exit
PB: predicated region body
PF: predicated region fallthrough
CT: control target
= control target key end

     0   :  { %vm423_vm0 = vcmask 257024   ;;  %s830_s1 = inlined_call_operand.vmem [shape: bf16[256,32], index: 1, kind: input, shape index: {}]   ;;  %s831_s0 = inlined_call_operand.vmem [shape: bf16[128,256], index: 0, kind: input, shape index: {}]   ;;  %s832_s2 = inlined_call_operand.vmem [shape: f32[1,32], index: 2, kind: input, shape index: {}]   ;;  %s833_s3 = inlined_call_operand.vmem [shape: bf16[128,32], index: 3, kind: output, shape index: {}]  }
   0x1   :  { %v589_v0 = vld [vmem:[%s830_s1 + $0x78] sm:$0xff]   ;;  %v591_v2 = vld [vmem:[%s830_s1 + $0x70] sm:$0xff]   ;;  %v593_v4 = vld [vmem:[%s830_s1 + $0x68] sm:$0xff]  }
   0x2   :  { %v590_v1 = vld [vmem:[%s830_s1 + $0x38] sm:$0xff]   ;;  %509 = vmatprep.subr.bf16.mxu0 %v589_v0  ;;  %573 = vmatprep.subr.bf16.mxu1 %v589_v0  ;;  %v592_v3 = vld [vmem:[%s830_s1 + $0x30] sm:$0xff]   ;;  %v594_v5 = vld [vmem:[%s830_s1 + $0x28] sm:$0xff]  }
   0x3   :  { %510 = vmatpush3.bf16.msra.mxu0 %v590_v1  ;;  %581 = vmatpush3.bf16.msra.mxu1 %v590_v1  ;;  %v595_v6 = vld [vmem:[%s830_s1 + $0x60] sm:$0xff]   ;;  %v597_v8 = vld [vmem:[%s830_s1 + $0x58] sm:$0xff]   ;;  %v599_v10 = vld [vmem:[%s830_s1 + $0x50] sm:$0xff]  }
   0x4   :  { %511 = vmatprep.subr.bf16.mxu0 %v591_v2  ;;  %574 = vmatprep.subr.bf16.mxu1 %v591_v2  ;;  %v596_v7 = vld [vmem:[%s830_s1 + $0x20] sm:$0xff]   ;;  %v598_v9 = vld [vmem:[%s830_s1 + $0x18] sm:$0xff]   ;;  %v600_v13 = vld [vmem:[%s830_s1 + $0x10] sm:$0xff]  }
   0x5   :  { %v607_v11 = vld [vmem:[%s831_s0 + $0x4] ss:$8 sps:$4 sm:$0xff]   ;;  %v605_v18 = vld [vmem:[%s831_s0] ss:$8 sps:$4 sm:$0xff]   ;;  %v611_v20 = vld [vmem:[%s831_s0 + $0x14] ss:$8 sps:$4 sm:$0xff]  }
   0x6   :  { %v610_v12 = vld [vmem:[%s831_s0 + $0x44] ss:$8 sps:$4 sm:$0xff]   ;;  %278 = vmatprep.mubr.bf16.mxu0 %v607_v11  ;;  %v608_v19 = vld [vmem:[%s831_s0 + $0x40] ss:$8 sps:$4 sm:$0xff]   ;;  %v613_v21 = vld [vmem:[%s831_s0 + $0x54] ss:$8 sps:$4 sm:$0xff]  }
   0x7   :  { %512 = vmatpush3.bf16.msra.mxu0 %v592_v3  ;;  %582 = vmatpush3.bf16.msra.mxu1 %v592_v3  ;;  %v601_v14 = vld [vmem:[%s830_s1 + $0x48] sm:$0xff]   ;;  %v603_v16 = vld [vmem:[%s830_s1 + $0x40] sm:$0xff]   ;;  %v615_v22 = vld [vmem:[%s831_s0 + $0x10] ss:$8 sps:$4 sm:$0xff]  }
   0x8   :  { %513 = vmatprep.subr.bf16.mxu0 %v593_v4  ;;  %575 = vmatprep.subr.bf16.mxu1 %v593_v4  ;;  %v602_v15 = vld [vmem:[%s830_s1 + $0x8] sm:$0xff]   ;;  %v604_v17 = vld [vmem:[%s830_s1] sm:$0xff]   ;;  %v616_v23 = vld [vmem:[%s831_s0 + $0x50] ss:$8 sps:$4 sm:$0xff]  }
   0x9   :  { %310 = vmatprep.mubr.bf16.mxu1 %v610_v12  ;;  %v617_v24 = vld [vmem:[%s831_s0 + $0x24] ss:$8 sps:$4 sm:$0xff]   ;;  %v621_v26 = vld [vmem:[%s831_s0 + $0x20] ss:$8 sps:$4 sm:$0xff]   ;;  %v623_v28 = vld [vmem:[%s831_s0 + $0x34] ss:$8 sps:$4 sm:$0xff]  }
   0xa   :  { %v619_v25 = vld [vmem:[%s831_s0 + $0x64] ss:$8 sps:$4 sm:$0xff]   ;;  %v622_v27 = vld [vmem:[%s831_s0 + $0x60] ss:$8 sps:$4 sm:$0xff]   ;;  %v625_v29 = vld [vmem:[%s831_s0 + $0x74] ss:$8 sps:$4 sm:$0xff]  }
   0xb   :  { %514 = vmatpush3.bf16.msra.mxu0 %v594_v5  ;;  %583 = vmatpush3.bf16.msra.mxu1 %v594_v5  ;;  %v627_v30 = vld [vmem:[%s831_s0 + $0x30] ss:$8 sps:$4 sm:$0xff]   ;;  %v748_v34 = vld [vmem:[%s832_s2] ss:$0 sm:$0xff] }
   0xc   :  { %515 = vmatprep.subr.bf16.mxu0 %v595_v6  ;;  %576 = vmatprep.subr.bf16.mxu1 %v595_v6  ;;  %v628_v31 = vld [vmem:[%s831_s0 + $0x70] ss:$8 sps:$4 sm:$0xff]  }
   0xf   :  { %516 = vmatpush3.bf16.msra.mxu0 %v596_v7  ;;  %584 = vmatpush3.bf16.msra.mxu1 %v596_v7 }
  0x10   :  { %517 = vmatprep.subr.bf16.mxu0 %v597_v8  ;;  %577 = vmatprep.subr.bf16.mxu1 %v597_v8 }
  0x13   :  { %518 = vmatpush3.bf16.msra.mxu0 %v598_v9  ;;  %585 = vmatpush3.bf16.msra.mxu1 %v598_v9 }
  0x14   :  { %519 = vmatprep.subr.bf16.mxu0 %v599_v10  ;;  %578 = vmatprep.subr.bf16.mxu1 %v599_v10 }
  0x17   :  { %520 = vmatpush3.bf16.msra.mxu0 %v600_v13  ;;  %586 = vmatpush3.bf16.msra.mxu1 %v600_v13 }
  0x18   :  { %521 = vmatprep.subr.bf16.mxu0 %v601_v14  ;;  %579 = vmatprep.subr.bf16.mxu1 %v601_v14 }
  0x1b   :  { %522 = vmatpush3.bf16.msra.mxu0 %v602_v15  ;;  %587 = vmatpush3.bf16.msra.mxu1 %v602_v15 }
  0x1c   :  { %523 = vmatprep.subr.bf16.mxu0 %v603_v16  ;;  %580 = vmatprep.subr.bf16.mxu1 %v603_v16 }
  0x1f   :  { %524 = vmatpush3.bf16.msra.mxu0 %v604_v17  ;;  %588 = vmatpush3.bf16.msra.mxu1 %v604_v17 }
  0x22   :  { %279 = vmatmul.mubr.bf16.vlgmr.msra.gmra.mxu0 %v605_v18  ;;  %311 = vmatmul.mubr.bf16.vlgmr.msra.gmra.mxu1 %v608_v19 }
  0x23   :  { %286 = vmatprep.mubr.bf16.mxu0 %v611_v20  ;;  %318 = vmatprep.mubr.bf16.mxu1 %v613_v21 }
  0x2a   :  { %287 = vmatmul.mubr.bf16.gmra.mxu0 %v615_v22  ;;  %319 = vmatmul.mubr.bf16.gmra.mxu1 %v616_v23 }
  0x2b   :  { %294 = vmatprep.mubr.bf16.mxu0 %v617_v24  ;;  %326 = vmatprep.mubr.bf16.mxu1 %v619_v25 }
  0x32   :  { %295 = vmatmul.mubr.bf16.gmra.mxu0 %v621_v26  ;;  %327 = vmatmul.mubr.bf16.gmra.mxu1 %v622_v27 }
  0x33   :  { %302 = vmatprep.mubr.bf16.mxu0 %v623_v28  ;;  %334 = vmatprep.mubr.bf16.mxu1 %v625_v29 }
  0x3a   :  { %303 = vmatmul.mubr.bf16.gmra.mxu0 %v627_v30  ;;  %335 = vmatmul.mubr.bf16.gmra.mxu1 %v628_v31 }
  0xe2   :  { %v525_v32 = vpop.f32.mrf.mxu0  ;;  %v549_v33 = vpop.f32.mrf.mxu1 }
  0xe4   :  { %v526_v35 = vpop.f32.mrf.mxu0  ;;  %v550_v36 = vpop.f32.mrf.mxu1 }
  0xe5   :  { %v527_v37 = vadd.f32 %v526_v35, %v525_v32  ;;  %v551_v38 = vadd.f32 %v550_v36, %v549_v33 }
  0xe6   :  { %v528_v39 = vpop.f32.mrf.mxu0  ;;  %v552_v40 = vpop.f32.mrf.mxu1 }
  0xe7   :  { %v281_v41 = vadd.f32 %v527_v37, %v748_v34  ;;  %v313_v42 = vadd.f32 %v551_v38, %v748_v34 }
  0xe8   :  { %v529_v43 = vpop.f32.mrf.mxu0  ;;  %v553_v44 = vpop.f32.mrf.mxu1 }
  0xe9   :  { %v343_v45 = vmax.f32 %v281_v41, 0.0  ;;  %v351_v46 = vmax.f32 %v313_v42, 0.0  ;;  %v530_v47 = vadd.f32 %v529_v43, %v528_v39  ;;  %v554_v48 = vadd.f32 %v553_v44, %v552_v40 }
  0xea   :  { %v531_v49 = vpop.f32.mrf.mxu0  ;;  %v555_v50 = vpop.f32.mrf.mxu1 }
  0xeb   :  { %v493_v51 = vpack.c.bf16 %v343_v45, %v343_v45  ;;  %v501_v52 = vpack.c.bf16 %v351_v46, %v351_v46  ;;  %v284_v53 = vadd.f32 %v530_v47, %v748_v34  ;;  %v316_v54 = vadd.f32 %v554_v48, %v748_v34 }
  0xec   :  { %v532_v55 = vpop.f32.mrf.mxu0  ;;  %v556_v56 = vpop.f32.mrf.mxu1 }
  0xed   :  { %424 = vst.msk [vmem:[%s833_s3] sm:$0xf] %vm423_vm0, %v493_v51  ;;  %432 = vst.msk [vmem:[%s833_s3 + $0x20] sm:$0xf] %vm423_vm0, %v501_v52  ;;  %v344_v57 = vmax.f32 %v284_v53, 0.0  ;;  %v352_v58 = vmax.f32 %v316_v54, 0.0  ;;  %v533_v59 = vadd.f32 %v532_v55, %v531_v49  ;;  %v557_v60 = vadd.f32 %v556_v56, %v555_v50 }
  0xee   :  { %v534_v61 = vpop.f32.mrf.mxu0  ;;  %v558_v62 = vpop.f32.mrf.mxu1 }
  0xef   :  { %v494_v63 = vpack.c.bf16 %v344_v57, %v344_v57  ;;  %v502_v0 = vpack.c.bf16 %v352_v58, %v352_v58  ;;  %v289_v1 = vadd.f32 %v533_v59, %v748_v34  ;;  %v321_v2 = vadd.f32 %v557_v60, %v748_v34 }
  0xf0   :  { %v535_v3 = vpop.f32.mrf.mxu0  ;;  %v559_v4 = vpop.f32.mrf.mxu1 }
  0xf1   :  { %425 = vst.msk [vmem:[%s833_s3 + $0x4] sm:$0xf] %vm423_vm0, %v494_v63  ;;  %433 = vst.msk [vmem:[%s833_s3 + $0x24] sm:$0xf] %vm423_vm0, %v502_v0  ;;  %v345_v5 = vmax.f32 %v289_v1, 0.0  ;;  %v353_v6 = vmax.f32 %v321_v2, 0.0  ;;  %v536_v7 = vadd.f32 %v535_v3, %v534_v61  ;;  %v560_v8 = vadd.f32 %v559_v4, %v558_v62 }
  0xf2   :  { %v537_v9 = vpop.f32.mrf.mxu0  ;;  %v561_v10 = vpop.f32.mrf.mxu1 }
  0xf3   :  { %v495_v11 = vpack.c.bf16 %v345_v5, %v345_v5  ;;  %v503_v12 = vpack.c.bf16 %v353_v6, %v353_v6  ;;  %v292_v13 = vadd.f32 %v536_v7, %v748_v34  ;;  %v324_v14 = vadd.f32 %v560_v8, %v748_v34 }
  0xf4   :  { %v538_v15 = vpop.f32.mrf.mxu0  ;;  %v562_v16 = vpop.f32.mrf.mxu1 }
  0xf5   :  { %426 = vst.msk [vmem:[%s833_s3 + $0x8] sm:$0xf] %vm423_vm0, %v495_v11  ;;  %434 = vst.msk [vmem:[%s833_s3 + $0x28] sm:$0xf] %vm423_vm0, %v503_v12  ;;  %v346_v17 = vmax.f32 %v292_v13, 0.0  ;;  %v354_v18 = vmax.f32 %v324_v14, 0.0  ;;  %v539_v19 = vadd.f32 %v538_v15, %v537_v9  ;;  %v563_v20 = vadd.f32 %v562_v16, %v561_v10 }
  0xf6   :  { %v540_v21 = vpop.f32.mrf.mxu0  ;;  %v564_v22 = vpop.f32.mrf.mxu1 }
  0xf7   :  { %v496_v23 = vpack.c.bf16 %v346_v17, %v346_v17  ;;  %v504_v24 = vpack.c.bf16 %v354_v18, %v354_v18  ;;  %v297_v25 = vadd.f32 %v539_v19, %v748_v34  ;;  %v329_v26 = vadd.f32 %v563_v20, %v748_v34 }
  0xf8   :  { %v541_v27 = vpop.f32.mrf.mxu0  ;;  %v565_v28 = vpop.f32.mrf.mxu1 }
  0xf9   :  { %427 = vst.msk [vmem:[%s833_s3 + $0xc] sm:$0xf] %vm423_vm0, %v496_v23  ;;  %435 = vst.msk [vmem:[%s833_s3 + $0x2c] sm:$0xf] %vm423_vm0, %v504_v24  ;;  %v347_v29 = vmax.f32 %v297_v25, 0.0  ;;  %v355_v30 = vmax.f32 %v329_v26, 0.0  ;;  %v542_v31 = vadd.f32 %v541_v27, %v540_v21  ;;  %v566_v32 = vadd.f32 %v565_v28, %v564_v22 }
  0xfa   :  { %v543_v33 = vpop.f32.mrf.mxu0  ;;  %v567_v35 = vpop.f32.mrf.mxu1 }
  0xfb   :  { %v497_v36 = vpack.c.bf16 %v347_v29, %v347_v29  ;;  %v505_v37 = vpack.c.bf16 %v355_v30, %v355_v30  ;;  %v300_v38 = vadd.f32 %v542_v31, %v748_v34  ;;  %v332_v39 = vadd.f32 %v566_v32, %v748_v34 }
  0xfc   :  { %v544_v40 = vpop.f32.mrf.mxu0  ;;  %v568_v41 = vpop.f32.mrf.mxu1 }
  0xfd   :  { %428 = vst.msk [vmem:[%s833_s3 + $0x10] sm:$0xf] %vm423_vm0, %v497_v36  ;;  %436 = vst.msk [vmem:[%s833_s3 + $0x30] sm:$0xf] %vm423_vm0, %v505_v37  ;;  %v348_v42 = vmax.f32 %v300_v38, 0.0  ;;  %v356_v43 = vmax.f32 %v332_v39, 0.0  ;;  %v545_v44 = vadd.f32 %v544_v40, %v543_v33  ;;  %v569_v45 = vadd.f32 %v568_v41, %v567_v35 }
  0xfe   :  { %v546_v46 = vpop.f32.mrf.mxu0  ;;  %v570_v47 = vpop.f32.mrf.mxu1 }
  0xff   :  { %v498_v48 = vpack.c.bf16 %v348_v42, %v348_v42  ;;  %v506_v49 = vpack.c.bf16 %v356_v43, %v356_v43  ;;  %v305_v50 = vadd.f32 %v545_v44, %v748_v34  ;;  %v337_v51 = vadd.f32 %v569_v45, %v748_v34 }
 0x100   :  { %v547_v52 = vpop.f32.mrf.mxu0  ;;  %v571_v53 = vpop.f32.mrf.mxu1 }
 0x101   :  { %429 = vst.msk [vmem:[%s833_s3 + $0x14] sm:$0xf] %vm423_vm0, %v498_v48  ;;  %437 = vst.msk [vmem:[%s833_s3 + $0x34] sm:$0xf] %vm423_vm0, %v506_v49  ;;  %v349_v54 = vmax.f32 %v305_v50, 0.0  ;;  %v357_v55 = vmax.f32 %v337_v51, 0.0  ;;  %v548_v56 = vadd.f32 %v547_v52, %v546_v46  ;;  %v572_v57 = vadd.f32 %v571_v53, %v570_v47 }
 0x103   :  { %v499_v58 = vpack.c.bf16 %v349_v54, %v349_v54  ;;  %v507_v59 = vpack.c.bf16 %v357_v55, %v357_v55  ;;  %v308_v60 = vadd.f32 %v548_v56, %v748_v34  ;;  %v340_v61 = vadd.f32 %v572_v57, %v748_v34 }
 0x105   :  { %430 = vst.msk [vmem:[%s833_s3 + $0x18] sm:$0xf] %vm423_vm0, %v499_v58  ;;  %438 = vst.msk [vmem:[%s833_s3 + $0x38] sm:$0xf] %vm423_vm0, %v507_v59  ;;  %v350_v62 = vmax.f32 %v308_v60, 0.0  ;;  %v358_v63 = vmax.f32 %v340_v61, 0.0 }
 0x107   :  { %v500_v0 = vpack.c.bf16 %v350_v62, %v350_v62  ;;  %v508_v1 = vpack.c.bf16 %v358_v63, %v358_v63 }
 0x109   :  { %431 = vst.msk [vmem:[%s833_s3 + $0x1c] sm:$0xf] %vm423_vm0, %v500_v0  ;;  %439 = vst.msk [vmem:[%s833_s3 + $0x3c] sm:$0xf] %vm423_vm0, %v508_v1 }

// kernel: actor_critic_forward.4
= control target key start
LH: loop header
LB: loop body
LE: loop exit
PB: predicated region body
PF: predicated region fallthrough
CT: control target
= control target key end

     0   :  { %vm430_vm0 = vcmask 519168   ;;  %vm433_vm1 = vcmask 516096   ;;  %s732_s1 = inlined_call_operand.vmem [shape: bf16[512,64], index: 1, kind: input, shape index: {}]   ;;  %s733_s0 = inlined_call_operand.vmem [shape: bf16[18,512], index: 0, kind: input, shape index: {}]   ;;  %s734_s2 = inlined_call_operand.vmem [shape: f32[1,64], index: 2, kind: input, shape index: {}]   ;;  %s735_s3 = inlined_call_operand.vmem [shape: bf16[18,64], index: 3, kind: output, shape index: {}]  }
   0x1   :  { %v542_v0 = vld [vmem:[%s732_s1 + $0x78] sm:$0xff]   ;;  %v546_v4 = vld [vmem:[%s732_s1 + $0x70] sm:$0xff]   ;;  %v550_v8 = vld [vmem:[%s732_s1 + $0x68] sm:$0xff]  }
   0x2   :  { %v543_v1 = vld [vmem:[%s732_s1 + $0xf8] sm:$0xff]   ;;  %486 = vmatprep.subr.bf16.mxu0 %v542_v0  ;;  %v547_v5 = vld [vmem:[%s732_s1 + $0xf0] sm:$0xff]   ;;  %v551_v9 = vld [vmem:[%s732_s1 + $0xe8] sm:$0xff]  }
   0x3   :  { %v544_v2 = vld [vmem:[%s732_s1 + $0x38] sm:$0xff]   ;;  %514 = vmatprep.subr.bf16.mxu1 %v543_v1  ;;  %v548_v6 = vld [vmem:[%s732_s1 + $0x30] sm:$0xff]   ;;  %v552_v10 = vld [vmem:[%s732_s1 + $0x28] sm:$0xff]  }
   0x4   :  { %v545_v3 = vld [vmem:[%s732_s1 + $0xb8] sm:$0xff]   ;;  %487 = vmatpush3.bf16.msra.mxu0 %v544_v2  ;;  %v549_v7 = vld [vmem:[%s732_s1 + $0xb0] sm:$0xff]   ;;  %v553_v11 = vld [vmem:[%s732_s1 + $0xa8] sm:$0xff]  }
   0x5   :  { %515 = vmatpush3.bf16.msra.mxu1 %v545_v3  ;;  %488 = vmatprep.subr.bf16.mxu0 %v546_v4  ;;  %v554_v12 = vld [vmem:[%s732_s1 + $0x60] sm:$0xff]   ;;  %v558_v16 = vld [vmem:[%s732_s1 + $0x58] sm:$0xff]   ;;  %v562_v20 = vld [vmem:[%s732_s1 + $0x50] sm:$0xff]  }
   0x6   :  { %516 = vmatprep.subr.bf16.mxu1 %v547_v5  ;;  %v555_v13 = vld [vmem:[%s732_s1 + $0xe0] sm:$0xff]   ;;  %v559_v17 = vld [vmem:[%s732_s1 + $0xd8] sm:$0xff]   ;;  %v563_v21 = vld [vmem:[%s732_s1 + $0xd0] sm:$0xff]  }
   0x7   :  { %v556_v14 = vld [vmem:[%s732_s1 + $0x20] sm:$0xff]   ;;  %v560_v18 = vld [vmem:[%s732_s1 + $0x18] sm:$0xff]   ;;  %v564_v22 = vld [vmem:[%s732_s1 + $0x10] sm:$0xff]  }
   0x8   :  { %489 = vmatpush3.bf16.msra.mxu0 %v548_v6  ;;  %v557_v15 = vld [vmem:[%s732_s1 + $0xa0] sm:$0xff]   ;;  %v561_v19 = vld [vmem:[%s732_s1 + $0x98] sm:$0xff]   ;;  %v565_v23 = vld [vmem:[%s732_s1 + $0x90] sm:$0xff]  }
   0x9   :  { %517 = vmatpush3.bf16.msra.mxu1 %v549_v7  ;;  %490 = vmatprep.subr.bf16.mxu0 %v550_v8  ;;  %v566_v24 = vld [vmem:[%s732_s1 + $0x48] sm:$0xff]   ;;  %v570_v28 = vld [vmem:[%s732_s1 + $0x40] sm:$0xff]  }
   0xa   :  { %518 = vmatprep.subr.bf16.mxu1 %v551_v9  ;;  %v567_v25 = vld [vmem:[%s732_s1 + $0xc8] sm:$0xff]   ;;  %v571_v29 = vld [vmem:[%s732_s1 + $0xc0] sm:$0xff]  }
   0xb   :  { %v568_v26 = vld [vmem:[%s732_s1 + $0x8] sm:$0xff]   ;;  %v572_v30 = vld [vmem:[%s732_s1] sm:$0xff]  }
   0xc   :  { %491 = vmatpush3.bf16.msra.mxu0 %v552_v10  ;;  %v569_v27 = vld [vmem:[%s732_s1 + $0x88] sm:$0xff]   ;;  %v573_v31 = vld [vmem:[%s732_s1 + $0x80] sm:$0xff]  }
   0xd   :  { %519 = vmatpush3.bf16.msra.mxu1 %v553_v11  ;;  %492 = vmatprep.subr.bf16.mxu0 %v554_v12  ;;  %v574_v32 = vld [vmem:[%s733_s0] ss:$16 sps:$4 sm:$0xff]   ;;  %v576_v33 = vld [vmem:[%s733_s0 + $0x4] ss:$16 sps:$4 sm:$0xff]   ;;  %v577_v34 = vld [vmem:[%s733_s0 + $0x8] ss:$16 sps:$4 sm:$0xff]  }
   0xe   :  { %520 = vmatprep.subr.bf16.mxu1 %v555_v13  ;;  %v579_v35 = vld [vmem:[%s733_s0 + $0xc] ss:$16 sps:$4 sm:$0xff]   ;;  %v19_v36 = vld [vmem:[%s733_s0 + $0x20] sm:$0x11]  ;;  %350 = vmatprep.mubr.bf16.mxu0 %v576_v33 }
   0xf   :  { %v445_v37 = vcombine.high %v19_v36, %v19_v36  ;;  %v20_v38 = vld [vmem:[%s733_s0 + $0x28] sm:$0x11]  ;;  %398 = vmatprep.mubr.bf16.mxu1 %v579_v35  ;;  %v444_v40 = vcombine.low %v19_v36, %v19_v36  ;;  %v439_v44 = vld [vmem:[%s734_s2] ss:$0 sm:$0xff] }
  0x10   :  { %493 = vmatpush3.bf16.msra.mxu0 %v556_v14  ;;  %v447_v39 = vcombine.high %v20_v38, %v20_v38  ;;  %v446_v41 = vcombine.low %v20_v38, %v20_v38 }
  0x11   :  { %521 = vmatpush3.bf16.msra.mxu1 %v557_v15  ;;  %494 = vmatprep.subr.bf16.mxu0 %v558_v16 }
  0x12   :  { %522 = vmatprep.subr.bf16.mxu1 %v559_v17 }
  0x14   :  { %495 = vmatpush3.bf16.msra.mxu0 %v560_v18 }
  0x15   :  { %523 = vmatpush3.bf16.msra.mxu1 %v561_v19  ;;  %496 = vmatprep.subr.bf16.mxu0 %v562_v20 }
  0x16   :  { %524 = vmatprep.subr.bf16.mxu1 %v563_v21 }
  0x18   :  { %497 = vmatpush3.bf16.msra.mxu0 %v564_v22 }
  0x19   :  { %525 = vmatpush3.bf16.msra.mxu1 %v565_v23  ;;  %498 = vmatprep.subr.bf16.mxu0 %v566_v24 }
  0x1a   :  { %526 = vmatprep.subr.bf16.mxu1 %v567_v25 }
  0x1c   :  { %499 = vmatpush3.bf16.msra.mxu0 %v568_v26 }
  0x1d   :  { %527 = vmatpush3.bf16.msra.mxu1 %v569_v27  ;;  %500 = vmatprep.subr.bf16.mxu0 %v570_v28 }
  0x1e   :  { %528 = vmatprep.subr.bf16.mxu1 %v571_v29 }
  0x20   :  { %501 = vmatpush3.bf16.msra.mxu0 %v572_v30 }
  0x21   :  { %529 = vmatpush3.bf16.msra.mxu1 %v573_v31 }
  0x23   :  { %351 = vmatmul.mubr.bf16.vlgmr.msra.gmra.mxu0 %v574_v32 }
  0x24   :  { %399 = vmatmul.mubr.bf16.vlgmr.msra.gmra.mxu1 %v577_v34  ;;  %358 = vmatprep.mubr.bf16.mxu0 %v445_v37 }
  0x25   :  { %406 = vmatprep.mubr.bf16.mxu1 %v447_v39 }
  0x2b   :  { %359 = vmatmul.mubr.bf16.gmra.mxu0 %v444_v40 }
  0x2c   :  { %407 = vmatmul.mubr.bf16.gmra.mxu1 %v446_v41 }
  0xe3   :  { %v502_v42 = vpop.f32.mrf.mxu0 }
  0xe4   :  { %v530_v43 = vpop.f32.mrf.mxu1 }
  0xe5   :  { %v503_v45 = vpop.f32.mrf.mxu0 }
  0xe6   :  { %v504_v46 = vadd.f32 %v503_v45, %v502_v42  ;;  %v531_v47 = vpop.f32.mrf.mxu1 }
  0xe7   :  { %v505_v48 = vpop.f32.mrf.mxu0  ;;  %v532_v50 = vadd.f32 %v531_v47, %v530_v43 }
  0xe8   :  { %v353_v49 = vadd.f32 %v504_v46, %v439_v44  ;;  %v533_v51 = vpop.f32.mrf.mxu1 }
  0xe9   :  { %v506_v52 = vpop.f32.mrf.mxu0 }
  0xea   :  { %v401_v53 = vadd.f32 %v532_v50, %v353_v49  ;;  %v507_v54 = vadd.f32 %v506_v52, %v505_v48  ;;  %v534_v55 = vpop.f32.mrf.mxu1 }
  0xeb   :  { %v508_v56 = vpop.f32.mrf.mxu0  ;;  %v535_v59 = vadd.f32 %v534_v55, %v533_v51 }
  0xec   :  { %v414_v57 = vmax.f32 %v401_v53, 0.0  ;;  %v356_v58 = vadd.f32 %v507_v54, %v439_v44  ;;  %v536_v60 = vpop.f32.mrf.mxu1 }
  0xed   :  { %v509_v61 = vpop.f32.mrf.mxu0 }
  0xee   :  { %v483_v62 = vpack.c.bf16 %v414_v57, %v414_v57  ;;  %v404_v63 = vadd.f32 %v535_v59, %v356_v58  ;;  %v510_v0 = vadd.f32 %v509_v61, %v508_v56  ;;  %v537_v1 = vpop.f32.mrf.mxu1 }
  0xef   :  { %v511_v2 = vpop.f32.mrf.mxu0  ;;  %v538_v5 = vadd.f32 %v537_v1, %v536_v60 }
  0xf0   :  { %431 = vst.msk [vmem:[%s735_s3] sm:$0xf] %vm430_vm0, %v483_v62  ;;  %v415_v3 = vmax.f32 %v404_v63, 0.0  ;;  %v361_v4 = vadd.f32 %v510_v0, %v439_v44  ;;  %v539_v6 = vpop.f32.mrf.mxu1 }
  0xf1   :  { %v512_v7 = vpop.f32.mrf.mxu0 }
  0xf2   :  { %v484_v8 = vpack.c.bf16 %v415_v3, %v415_v3  ;;  %v409_v9 = vadd.f32 %v538_v5, %v361_v4  ;;  %v540_v10 = vpop.f32.mrf.mxu1 }
  0xf4   :  { %432 = vst.msk [vmem:[%s735_s3 + $0x4] sm:$0xf] %vm430_vm0, %v484_v8  ;;  %v416_v11 = vmax.f32 %v409_v9, 0.0 }
  0xf6   :  { %v485_v12 = vpack.c.bf16 %v416_v11, %v416_v11 }
  0xf8   :  { %434 = vst.msk [vmem:[%s735_s3 + $0x8] sm:$0x1] %vm433_vm1, %v485_v12 }

// kernel: actor_critic_forward.5
= control target key start
LH: loop header
LB: loop body
LE: loop exit
PB: predicated region body
PF: predicated region fallthrough
CT: control target
= control target key end

     0   :  { %v880_v21 = vmov 1966171168   ;;  %v112_v23 = vlaneseq  ;;  %v881_v40 = vmov 0.0   ;;  %vm882_vm0 = vmmov 0   ;;  %s1095_s1 = inlined_call_operand.vmem [shape: bf16[576,64], index: 1, kind: input, shape index: {}]   ;;  %s1096_s0 = inlined_call_operand.vmem [shape: bf16[2,576], index: 0, kind: input, shape index: {}]   ;;  %s1097_s3 = inlined_call_operand.vmem [shape: bf16[64,64], index: 3, kind: input, shape index: {}]   ;;  %s1098_s5 = inlined_call_operand.vmem [shape: bf16[64,128], index: 5, kind: input, shape index: {}]   ;;  %s1099_s2 = inlined_call_operand.vmem [shape: f32[1,64], index: 2, kind: input, shape index: {}]   ;;  %s1100_s4 = inlined_call_operand.vmem [shape: f32[1,64], index: 4, kind: input, shape index: {}]   ;;  %s1101_s6 = inlined_call_operand.vmem [shape: f32[1,128], index: 6, kind: input, shape index: {}]   ;;  %s1102_s7 = inlined_call_operand.vmem [shape: f32[2,128], index: 7, kind: output, shape index: {}]  }
   0x1   :  { %v831_v0 = vld [vmem:[%s1095_s1 + $0x78] sm:$0xff]   ;;  %v835_v4 = vld [vmem:[%s1095_s1 + $0x70] sm:$0xff]   ;;  %v839_v8 = vld [vmem:[%s1095_s1 + $0x68] sm:$0xff]   ;;  %v110_v22 = vunpack.c.l.s4 %v880_v21  ;;  %vm367_vm1 = vcmask 523264   ;;  %vm663_vm4 = vcmask 1041408  }
   0x2   :  { %v832_v1 = vld [vmem:[%s1095_s1 + $0x38] sm:$0xff]   ;;  %733 = vmatprep.subr.bf16.mxu0 %v831_v0  ;;  %v836_v5 = vld [vmem:[%s1095_s1 + $0x30] sm:$0xff]   ;;  %v840_v9 = vld [vmem:[%s1095_s1 + $0x28] sm:$0xff]   ;;  %v113_v29 = vshrl.u32 %v112_v23, 7 }
   0x3   :  { %v833_v2 = vld [vmem:[%s1095_s1 + $0xf8] sm:$0xff]   ;;  %734 = vmatpush3.bf16.msra.mxu0 %v832_v1  ;;  %v837_v6 = vld [vmem:[%s1095_s1 + $0xf0] sm:$0xff]   ;;  %v841_v10 = vld [vmem:[%s1095_s1 + $0xe8] sm:$0xff]   ;;  %v111_v28 = vunpack.c.0.s8 %v110_v22 }
   0x4   :  { %v834_v3 = vld [vmem:[%s1095_s1 + $0xb8] sm:$0xff]   ;;  %755 = vmatprep.subr.bf16.mxu1 %v833_v2  ;;  %735 = vmatprep.subr.bf16.mxu0 %v835_v4  ;;  %v838_v7 = vld [vmem:[%s1095_s1 + $0xb0] sm:$0xff]   ;;  %v842_v11 = vld [vmem:[%s1095_s1 + $0xa8] sm:$0xff]  }
   0x5   :  { %756 = vmatpush3.bf16.msra.mxu1 %v834_v3  ;;  %v843_v12 = vld [vmem:[%s1095_s1 + $0x60] sm:$0xff]   ;;  %v847_v16 = vld [vmem:[%s1095_s1 + $0x58] sm:$0xff]   ;;  %v851_v20 = vld [vmem:[%s1095_s1 + $0x50] sm:$0xff]   ;;  %v114_v34 = vsub.s32 %v111_v28, %v113_v29 }
   0x6   :  { %757 = vmatprep.subr.bf16.mxu1 %v837_v6  ;;  %v844_v13 = vld [vmem:[%s1095_s1 + $0x20] sm:$0xff]   ;;  %v848_v17 = vld [vmem:[%s1095_s1 + $0x18] sm:$0xff]   ;;  %v852_v24 = vld [vmem:[%s1095_s1 + $0x10] sm:$0xff]  }
   0x7   :  { %736 = vmatpush3.bf16.msra.mxu0 %v836_v5  ;;  %v845_v14 = vld [vmem:[%s1095_s1 + $0xe0] sm:$0xff]   ;;  %v849_v18 = vld [vmem:[%s1095_s1 + $0xd8] sm:$0xff]   ;;  %v853_v25 = vld [vmem:[%s1095_s1 + $0xd0] sm:$0xff]  }
   0x8   :  { %737 = vmatprep.subr.bf16.mxu0 %v839_v8  ;;  %v846_v15 = vld [vmem:[%s1095_s1 + $0xa0] sm:$0xff]   ;;  %v850_v19 = vld [vmem:[%s1095_s1 + $0x98] sm:$0xff]   ;;  %v854_v26 = vld [vmem:[%s1095_s1 + $0x90] sm:$0xff]  }
   0x9   :  { %758 = vmatpush3.bf16.msra.mxu1 %v838_v7  ;;  %v855_v27 = vld [vmem:[%s1095_s1 + $0x48] sm:$0xff]   ;;  %v859_v33 = vld [vmem:[%s1095_s1 + $0x40] sm:$0xff]   ;;  %v864_v44 = vld [vmem:[%s1095_s1 + $0x118] sm:$0xff]  }
   0xa   :  { %759 = vmatprep.subr.bf16.mxu1 %v841_v10  ;;  %v856_v30 = vld [vmem:[%s1095_s1 + $0x8] sm:$0xff]   ;;  %v860_v35 = vld [vmem:[%s1095_s1] sm:$0xff]   ;;  %v865_v47 = vld [vmem:[%s1095_s1 + $0x110] sm:$0xff]  }
   0xb   :  { %738 = vmatpush3.bf16.msra.mxu0 %v840_v9  ;;  %v857_v31 = vld [vmem:[%s1095_s1 + $0xc8] sm:$0xff]   ;;  %v861_v36 = vld [vmem:[%s1095_s1 + $0xc0] sm:$0xff]   ;;  %v868_v53 = vld [vmem:[%s1097_s3 + $0x18] sm:$0xff]  }
   0xc   :  { %739 = vmatprep.subr.bf16.mxu0 %v843_v12  ;;  %v858_v32 = vld [vmem:[%s1095_s1 + $0x88] sm:$0xff]   ;;  %v27_v37 = vld [vmem:[%s1096_s0] sm:$0x1f]  ;;  %v869_v54 = vld [vmem:[%s1097_s3 + $0x10] sm:$0xff]  }
   0xd   :  { %760 = vmatpush3.bf16.msra.mxu1 %v842_v11  ;;  %v115_v38 = vrot.slane %v27_v37, %v114_v34  ;;  %v863_v39 = vld [vmem:[%s1095_s1 + $0x80] sm:$0xff]   ;;  %v108_v48 = vcombine.high %v27_v37, %v27_v37  ;;  %v866_v49 = vld [vmem:[%s1095_s1 + $0x108] sm:$0xff]   ;;  %v872_v57 = vld [vmem:[%s1098_s5 + $0x18] sm:$0xff]  }
   0xe   :  { %761 = vmatprep.subr.bf16.mxu1 %v845_v14  ;;  %v867_v51 = vld [vmem:[%s1095_s1 + $0x100] sm:$0xff]   ;;  %v870_v55 = vld [vmem:[%s1097_s3 + $0x8] sm:$0xff]   ;;  %v873_v58 = vld [vmem:[%s1098_s5 + $0x10] sm:$0xff]  }
   0xf   :  { %740 = vmatpush3.bf16.msra.mxu0 %v844_v13  ;;  %v123_v41 = vcombine.high %v115_v38, %v115_v38  ;;  %v130_v42 = vrot.slane %v115_v38, %v114_v34  ;;  %v122_v50 = vrot.slane %v108_v48, %v114_v34  ;;  %v871_v56 = vld [vmem:[%s1097_s3] sm:$0xff]  }
  0x10   :  { %741 = vmatprep.subr.bf16.mxu0 %v847_v16  ;;  %v683_v3 = vld [vmem:[%s1099_s2] ss:$0 sm:$0xff] }
  0x11   :  { %762 = vmatpush3.bf16.msra.mxu1 %v846_v15  ;;  %v144_v43 = vrot.slane %v123_v41, %v114_v34  ;;  %v145_v45 = vcombine.high %v130_v42, %v130_v42  ;;  %v137_v52 = vrot.slane %v122_v50, %v114_v34  ;;  %v874_v15 = vld [vmem:[%s1098_s5 + $0x8] sm:$0xff]   ;;  %v875_v16 = vld [vmem:[%s1098_s5] sm:$0xff]  }
  0x12   :  { %763 = vmatprep.subr.bf16.mxu1 %v849_v18 }
  0x13   :  { %742 = vmatpush3.bf16.msra.mxu0 %v848_v17  ;;  %403 = vmatprep.mubr.bf16.mxu0 %v144_v43  ;;  %v146_v46 = vcombine.high %v144_v43, %v144_v43  ;;  %v721_v17 = vld [vmem:[%s1100_s4] ss:$0 sm:$0xff] }
  0x14   :  { %743 = vmatprep.subr.bf16.mxu0 %v851_v20 }
  0x15   :  { %764 = vmatpush3.bf16.msra.mxu1 %v850_v19  ;;  %443 = vmatprep.mubr.bf16.mxu1 %v146_v46 }
  0x16   :  { %765 = vmatprep.subr.bf16.mxu1 %v853_v25 }
  0x17   :  { %744 = vmatpush3.bf16.msra.mxu0 %v852_v24 }
  0x18   :  { %745 = vmatprep.subr.bf16.mxu0 %v855_v27  ;;  %v727_v27 = vld [vmem:[%s1101_s6] ss:$0 sm:$0xff] }
  0x19   :  { %766 = vmatpush3.bf16.msra.mxu1 %v854_v26  ;;  %v660_v26 = vand.u32 127, %v112_v23 }
  0x1a   :  { %767 = vmatprep.subr.bf16.mxu1 %v857_v31 }
  0x1b   :  { %746 = vmatpush3.bf16.msra.mxu0 %v856_v30  ;;  %vm675_vm2 = vcmp.eq.s32.totalorder %v660_v26, 6  ;;  %vm661_vm3 = vcmp.lt.s32.totalorder %v660_v26, 6 }
  0x1c   :  { %747 = vmatprep.subr.bf16.mxu0 %v859_v33 }
  0x1d   :  { %768 = vmatpush3.bf16.msra.mxu1 %v858_v32 }
  0x1e   :  { %769 = vmatprep.subr.bf16.mxu1 %v861_v36 }
  0x1f   :  { %748 = vmatpush3.bf16.msra.mxu0 %v860_v35 }
  0x20   :  { %792 = vmatprep.subr.bf16.mxu0 %v881_v40 }
  0x21   :  { %770 = vmatpush3.bf16.msra.mxu1 %v863_v39 }
  0x22   :  { %804 = vmatprep.subr.bf16.mxu1 %v881_v40  ;;  %404 = vmatmul.mubr.bf16.vlgmr.msra.gmra.mxu0 %v130_v42 }
  0x23   :  { %793 = vmatpush3.bf16.msra.mxu0 %v864_v44  ;;  %800 = vmatprep.mubr.msk.bf16.mxu0 %vm882_vm0, %v881_v40 }
  0x24   :  { %444 = vmatmul.mubr.bf16.vlgmr.msra.gmra.mxu1 %v145_v45  ;;  %794 = vmatprep.subr.bf16.mxu0 %v881_v40 }
  0x25   :  { %812 = vmatprep.mubr.msk.bf16.mxu1 %vm882_vm0, %v881_v40  ;;  %805 = vmatpush3.bf16.msra.mxu1 %v868_v53 }
  0x26   :  { %806 = vmatprep.subr.bf16.mxu1 %v881_v40 }
  0x27   :  { %795 = vmatpush3.bf16.msra.mxu0 %v865_v47 }
  0x28   :  { %796 = vmatprep.subr.bf16.mxu0 %v881_v40 }
  0x29   :  { %807 = vmatpush3.bf16.msra.mxu1 %v869_v54 }
  0x2a   :  { %808 = vmatprep.subr.bf16.mxu1 %v881_v40 }
  0x2b   :  { %797 = vmatpush3.bf16.msra.mxu0 %v866_v49 }
  0x2c   :  { %798 = vmatprep.subr.bf16.mxu0 %v881_v40 }
  0x2d   :  { %809 = vmatpush3.bf16.msra.mxu1 %v870_v55 }
  0x2e   :  { %810 = vmatprep.subr.bf16.mxu1 %v881_v40 }
  0x2f   :  { %799 = vmatpush3.bf16.msra.mxu0 %v867_v51 }
  0x30   :  { %816 = vmatprep.subr.bf16.mxu0 %v881_v40 }
  0x31   :  { %811 = vmatpush3.bf16.msra.mxu1 %v871_v56 }
  0x32   :  { %801 = vmatmul.mubr.msk.bf16.vlgmr.msra.gmra.mxu0 %vm367_vm1, %v137_v52 }
  0x33   :  { %824 = vmatprep.mubr.msk.bf16.mxu0 %vm882_vm0, %v881_v40  ;;  %817 = vmatpush3.bf16.msra.mxu0 %v872_v57 }
  0x34   :  { %818 = vmatprep.subr.bf16.mxu0 %v881_v40 }
  0x37   :  { %819 = vmatpush3.bf16.msra.mxu0 %v873_v58 }
  0x38   :  { %820 = vmatprep.subr.bf16.mxu0 %v881_v40 }
  0x3b   :  { %821 = vmatpush3.bf16.msra.mxu0 %v874_v15 }
  0x3c   :  { %822 = vmatprep.subr.bf16.mxu0 %v881_v40 }
  0x3f   :  { %823 = vmatpush3.bf16.msra.mxu0 %v875_v16 }
  0xe2   :  { %v749_v59 = vpop.f32.mrf.mxu0 }
  0xe4   :  { %v750_v60 = vpop.f32.mrf.mxu0  ;;  %v771_v61 = vpop.f32.mrf.mxu1 }
  0xe5   :  { %v751_v2 = vadd.f32 %v750_v60, %v749_v59 }
  0xe6   :  { %v752_v62 = vpop.f32.mrf.mxu0  ;;  %v772_v63 = vpop.f32.mrf.mxu1 }
  0xe7   :  { %v406_v5 = vadd.f32 %v751_v2, %v683_v3  ;;  %v773_v6 = vadd.f32 %v772_v63, %v771_v61 }
  0xe8   :  { %v753_v0 = vpop.f32.mrf.mxu0  ;;  %v774_v1 = vpop.f32.mrf.mxu1 }
  0xe9   :  { %v446_v7 = vadd.f32 %v773_v6, %v406_v5 }
  0xea   :  { %v775_v4 = vpop.f32.mrf.mxu1 }
  0xf2   :  { %v485_v8 = vpop.f32.mrf.mxu0 }
  0xf3   :  { %v486_v9 = vadd.f32 %v485_v8, %v446_v7 }
  0xf4   :  { %v802_v10 = vpop.f32.mrf.mxu0 }
  0xf5   :  { %v491_v11 = vmax.f32 %v486_v9, 0.0 }
  0xf6   :  { %v488_v12 = vpop.f32.mrf.mxu0 }
  0xf7   :  { %v492_v13 = vpack.c.bf16 %v491_v11, %v491_v11 }
  0xf8   :  { %v803_v14 = vpop.f32.mrf.mxu0 }
  0xf9   :  { %813 = vmatmul.mubr.msk.bf16.vlgmr.msra.gmra.mxu1 %vm367_vm1, %v492_v13 }
 0x1b9   :  { %v569_v18 = vpop.f32.mrf.mxu1 }
 0x1ba   :  { %v570_v19 = vadd.f32 %v721_v17, %v569_v18 }
 0x1bb   :  { %v814_v20 = vpop.f32.mrf.mxu1 }
 0x1bc   :  { %v575_v21 = vmax.f32 %v570_v19, 0.0 }
 0x1bd   :  { %v572_v22 = vpop.f32.mrf.mxu1 }
 0x1be   :  { %v576_v24 = vpack.c.bf16 %v575_v21, %v575_v21 }
 0x1bf   :  { %v815_v25 = vpop.f32.mrf.mxu1 }
 0x1c0   :  { %825 = vmatmul.mubr.msk.bf16.vlgmr.msra.gmra.mxu0 %vm367_vm1, %v576_v24 }
 0x280   :  { %v653_v28 = vpop.f32.mrf.mxu0 }
 0x281   :  { %v654_v29 = vadd.f32 %v727_v27, %v653_v28 }
 0x282   :  { %v826_v30 = vpop.f32.mrf.mxu0 }
 0x283   :  { %v676_v31 = vsel %vm675_vm2, %v654_v29, 0.0  ;;  %v662_v32 = vsel %vm661_vm3, %v654_v29, -1e+30 }
 0x284   :  { %v656_v33 = vpop.f32.mrf.mxu0  ;;  %v664_v34 = vsel %vm663_vm4, %v662_v32, -inf }
 0x285   :  { %665 = vmax.xlane.f32.xlu0 %v664_v34 }
 0x286   :  { %v827_v35 = vpop.f32.mrf.mxu0 }
 0x30e   :  { %v666_v36 = vpop.xlane.xlu0 %665 }
 0x30f   :  { %v667_v37 = vsub.f32 %v662_v32, %v666_v36 }
 0x311   :  { %v668_v23 = vmul.f32 1.442695, %v667_v37 }
 0x313   :  { %876 = vpow2.f32 %v668_v23 }
 0x320   :  { %v877_v38 = vpop.eup %876 }
 0x321   :  { %v670_v39 = vsel %vm663_vm4, %v877_v38, 0.0 }
 0x322   :  { %671 = vadd.xlane.f32.xlu0 %v670_v39 }
 0x3ab   :  { %v672_v40 = vpop.xlane.xlu0 %671 }
 0x3ac   :  { %878 = vrcp.f32 %v672_v40 }
 0x3b9   :  { %v879_v41 = vpop.eup %878 }
 0x3ba   :  { %v674_v42 = vmul.f32 %v879_v41, %v877_v38 }
 0x3bc   :  { %v677_v43 = vsel %vm661_vm3, %v674_v42, %v676_v31 }
 0x3bd   :  { %678 = vst [vmem:[%s1102_s7] sm:$0x3] %v677_v43 }

</bundles_post_ra>
